<compile_context>
chip_gen: v7x
topology: tpu7x:2x2x1
jax: 0.10.0
libtpu: 0.0.40
codegen_flags: <defaults>
</compile_context>

<pallas_src>
import jax
import jax.numpy as jnp
from jax import lax
from jax.experimental import pallas as pl
from jax.experimental.pallas import tpu as pltpu


def _ffd_kernel(s_ref, t_ref, ss_ref, tt_ref, st_ref):
    # s_ref / t_ref: (BB, C, N) blocks.  Feed the MXU in the input dtype
    # (bf16 stays bf16); only the (BB, C, C) Gram outputs are f32.
    fs = s_ref[...]
    ft = t_ref[...]

    # Batched Gram over channels, contracting the (lane-major) N axis:
    # (BB, C, N) x (BB, C, N) -> (BB, C, C).
    dn = (((2,), (2,)), ((0,), (0,)))
    g_s = lax.dot_general(fs, fs, dn, preferred_element_type=jnp.float32)
    g_t = lax.dot_general(ft, ft, dn, preferred_element_type=jnp.float32)

    # sum((A^T B)^2) = sum((A A^T) * (B B^T))  (trace identity).
    ss = jnp.sum(g_s * g_s)
    tt = jnp.sum(g_t * g_t)
    st = jnp.sum(g_s * g_t)

    # Lane-dense (1, 1, 128) partial-sum blocks (unmasked lane stores); each
    # grid step owns its own block, so the grid axis stays "parallel".
    ss_ref[...] = jnp.full(ss_ref.shape, ss, dtype=ss_ref.dtype)
    tt_ref[...] = jnp.full(tt_ref.shape, tt, dtype=tt_ref.dtype)
    st_ref[...] = jnp.full(st_ref.shape, st, dtype=st_ref.dtype)


def ffd_loss(g_s, g_t, *, block_b=None, vmem_limit_bytes=48 * 1024 * 1024):
    assert g_s.shape == g_t.shape, (g_s.shape, g_t.shape)
    B, C, N = g_s.shape
    itemsize = jnp.dtype(g_s.dtype).itemsize

    # Choose the batch block so that double-buffered input tiles (2 inputs x
    # 2 buffers) plus the two (BB, C, C) f32 Grams fit comfortably inside a
    # VMEM budget that is also safe for v7x's smaller (64 MiB) VMEM.
    if block_b is None:
        per_batch = 4 * C * N * itemsize + 8 * C * C * 4
        budget = 24 * 1024 * 1024
        block_b = int(max(1, min(B, budget // max(per_batch, 1), 512)))
    num_blocks = pl.cdiv(B, block_b)
    b_pad = num_blocks * block_b
    if b_pad != B:
        # Zero padding contributes exactly zero to every Gram sum.
        pad = ((0, b_pad - B), (0, 0), (0, 0))
        g_s = jnp.pad(g_s, pad)
        g_t = jnp.pad(g_t, pad)

    part_shape = jax.ShapeDtypeStruct((num_blocks, 1, 128), jnp.float32)
    part_spec = pl.BlockSpec((1, 1, 128), lambda g: (g, 0, 0))
    in_spec = pl.BlockSpec((block_b, C, N), lambda g: (g, 0, 0))

    cost = pl.CostEstimate(
        flops=4 * b_pad * C * C * N,                      # two CxC Grams / batch elem
        transcendentals=0,
        bytes_accessed=2 * b_pad * C * N * itemsize + 3 * num_blocks * 128 * 4,
    )

    ss_part, tt_part, st_part = pl.pallas_call(
        _ffd_kernel,
        out_shape=(part_shape, part_shape, part_shape),
        grid_spec=pltpu.PrefetchScalarGridSpec(
            num_scalar_prefetch=0,
            grid=(num_blocks,),
            in_specs=[in_spec, in_spec],
            out_specs=(part_spec, part_spec, part_spec),
        ),
        compiler_params=pltpu.CompilerParams(
            dimension_semantics=("parallel",),
            vmem_limit_bytes=vmem_limit_bytes,
        ),
        cost_estimate=cost,
    )(g_s, g_t)

    denom = jnp.float32(B * N * N)
    mean_ss = jnp.sum(ss_part[:, 0, 0]) / denom
    mean_tt = jnp.sum(tt_part[:, 0, 0]) / denom
    mean_st = jnp.sum(st_part[:, 0, 0]) / denom
    # Match the PyTorch .detach() on the K_tt term (forward value unchanged).
    return lax.stop_gradient(mean_tt) + mean_ss - 2.0 * mean_st


def _ffd_reference(g_s, g_t):
    def poly(a, b):
        k = jnp.einsum("bcn,bcm->bnm", a, b)
        return k * k

    return (jnp.mean(poly(g_t, g_t))
            + jnp.mean(poly(g_s, g_s))
            - 2.0 * jnp.mean(poly(g_s, g_t)))


if __name__ == "__main__":
    key = jax.random.PRNGKey(0)
    k1, k2 = jax.random.split(key, 2)

    # Shapes consistent with the module: (batch, channels, flattened spatial).
    B, C, N = 2, 4, 16
    g_s = jax.random.normal(k1, (B, C, N), dtype=jnp.float32)
    g_t = jax.random.normal(k2, (B, C, N), dtype=jnp.float32)

    out = jax.block_until_ready(ffd_loss(g_s, g_t))
    ref = jax.block_until_ready(_ffd_reference(g_s, g_t))
    assert jnp.allclose(out, ref, rtol=1e-5, atol=1e-5), (out, ref)

    print("KERNEL_OK")
</pallas_src>

<mosaic_0001>
module attributes {stable_mosaic.version = 11 : i64} {
  func.func @_ffd_kernel(%arg0: i32, %arg1: memref<2x4x16xf32, #tpu.memory_space<vmem>>, %arg2: memref<2x4x16xf32, #tpu.memory_space<vmem>>, %arg3: memref<1x1x128xf32, #tpu.memory_space<vmem>>, %arg4: memref<1x1x128xf32, #tpu.memory_space<vmem>>, %arg5: memref<1x1x128xf32, #tpu.memory_space<vmem>>) attributes {dimension_semantics = [#tpu.dimension_semantics<parallel>], iteration_bounds = array<i64: 1>, scalar_prefetch = 0 : i64, scratch_operands = 0 : i64, tpu.core_type = #tpu.core_type<tc>, window_params = [{transform_indices = @transform_0, window_bounds = array<i64: 2, 4, 16>}, {transform_indices = @transform_1, window_bounds = array<i64: 2, 4, 16>}, {transform_indices = @transform_2, window_bounds = array<i64: 1, 1, 128>}, {transform_indices = @transform_3, window_bounds = array<i64: 1, 1, 128>}, {transform_indices = @transform_4, window_bounds = array<i64: 1, 1, 128>}]} {
    %c0 = arith.constant 0 : index
    %c0_0 = arith.constant 0 : index
    %c0_1 = arith.constant 0 : index
    %0 = vector.load %arg1[%c0, %c0_0, %c0_1] : memref<2x4x16xf32, #tpu.memory_space<vmem>>, vector<2x4x16xf32>
    %c0_2 = arith.constant 0 : index
    %c0_3 = arith.constant 0 : index
    %c0_4 = arith.constant 0 : index
    %1 = vector.load %arg2[%c0_2, %c0_3, %c0_4] : memref<2x4x16xf32, #tpu.memory_space<vmem>>, vector<2x4x16xf32>
    %cst = arith.constant dense<0.000000e+00> : vector<2x4x4xf32>
    %2 = tpu.matmul %0, %0, %cst {dimension_numbers = #tpu.dot_dimension_numbers<[2], [2], [1], [1], [0, 0, 0, 1, 1, 1], [0], [0]>} : vector<2x4x16xf32>, vector<2x4x16xf32>, vector<2x4x4xf32> -> vector<2x4x4xf32>
    %cst_5 = arith.constant dense<0.000000e+00> : vector<2x4x4xf32>
    %3 = tpu.matmul %1, %1, %cst_5 {dimension_numbers = #tpu.dot_dimension_numbers<[2], [2], [1], [1], [0, 0, 0, 1, 1, 1], [0], [0]>} : vector<2x4x16xf32>, vector<2x4x16xf32>, vector<2x4x4xf32> -> vector<2x4x4xf32>
    %4 = arith.mulf %2, %2 : vector<2x4x4xf32>
    %5 = vector.shape_cast %4 : vector<2x4x4xf32> to vector<1x2x4x4xf32>
    %cst_6 = arith.constant dense<0.000000e+00> : vector<1xf32>
    %6 = vector.multi_reduction <add>, %5, %cst_6 [1, 2, 3] : vector<1x2x4x4xf32> to vector<1xf32>
    %7 = vector.shape_cast %6 : vector<1xf32> to vector<1x1x1x1xf32>
    %8 = vector.extract %7[0, 0, 0, 0] : f32 from vector<1x1x1x1xf32>
    %9 = arith.mulf %3, %3 : vector<2x4x4xf32>
    %10 = vector.shape_cast %9 : vector<2x4x4xf32> to vector<1x2x4x4xf32>
    %cst_7 = arith.constant dense<0.000000e+00> : vector<1xf32>
    %11 = vector.multi_reduction <add>, %10, %cst_7 [1, 2, 3] : vector<1x2x4x4xf32> to vector<1xf32>
    %12 = vector.shape_cast %11 : vector<1xf32> to vector<1x1x1x1xf32>
    %13 = vector.extract %12[0, 0, 0, 0] : f32 from vector<1x1x1x1xf32>
    %14 = arith.mulf %2, %3 : vector<2x4x4xf32>
    %15 = vector.shape_cast %14 : vector<2x4x4xf32> to vector<1x2x4x4xf32>
    %cst_8 = arith.constant dense<0.000000e+00> : vector<1xf32>
    %16 = vector.multi_reduction <add>, %15, %cst_8 [1, 2, 3] : vector<1x2x4x4xf32> to vector<1xf32>
    %17 = vector.shape_cast %16 : vector<1xf32> to vector<1x1x1x1xf32>
    %18 = vector.extract %17[0, 0, 0, 0] : f32 from vector<1x1x1x1xf32>
    %19 = vector.broadcast %8 : f32 to vector<1x1x128xf32>
    %c0_9 = arith.constant 0 : index
    %c0_10 = arith.constant 0 : index
    %c0_11 = arith.constant 0 : index
    %20 = vector.load %arg3[%c0_9, %c0_10, %c0_11] : memref<1x1x128xf32, #tpu.memory_space<vmem>>, vector<1x1x128xf32>
    tpu.vector_store %arg3[%c0_9, %c0_10, %c0_11], %19 {strides = array<i32>} : memref<1x1x128xf32, #tpu.memory_space<vmem>>, vector<1x1x128xf32>,
    %21 = vector.broadcast %13 : f32 to vector<1x1x128xf32>
    %c0_12 = arith.constant 0 : index
    %c0_13 = arith.constant 0 : index
    %c0_14 = arith.constant 0 : index
    %22 = vector.load %arg4[%c0_12, %c0_13, %c0_14] : memref<1x1x128xf32, #tpu.memory_space<vmem>>, vector<1x1x128xf32>
    tpu.vector_store %arg4[%c0_12, %c0_13, %c0_14], %21 {strides = array<i32>} : memref<1x1x128xf32, #tpu.memory_space<vmem>>, vector<1x1x128xf32>,
    %23 = vector.broadcast %18 : f32 to vector<1x1x128xf32>
    %c0_15 = arith.constant 0 : index
    %c0_16 = arith.constant 0 : index
    %c0_17 = arith.constant 0 : index
    %24 = vector.load %arg5[%c0_15, %c0_16, %c0_17] : memref<1x1x128xf32, #tpu.memory_space<vmem>>, vector<1x1x128xf32>
    tpu.vector_store %arg5[%c0_15, %c0_16, %c0_17], %23 {strides = array<i32>} : memref<1x1x128xf32, #tpu.memory_space<vmem>>, vector<1x1x128xf32>,
    return
  }
  func.func @transform_0(%arg0: i32) -> (i32, i32, i32) {
    %c0_i32 = arith.constant 0 : i32
    %c0_i32_0 = arith.constant 0 : i32
    %c0_i32_1 = arith.constant 0 : i32
    return %arg0, %c0_i32, %c0_i32_0 : i32, i32, i32
  }
  func.func @transform_1(%arg0: i32) -> (i32, i32, i32) {
    %c0_i32 = arith.constant 0 : i32
    %c0_i32_0 = arith.constant 0 : i32
    %c0_i32_1 = arith.constant 0 : i32
    return %arg0, %c0_i32, %c0_i32_0 : i32, i32, i32
  }
  func.func @transform_2(%arg0: i32) -> (i32, i32, i32) {
    %c0_i32 = arith.constant 0 : i32
    %c0_i32_0 = arith.constant 0 : i32
    %c0_i32_1 = arith.constant 0 : i32
    return %arg0, %c0_i32, %c0_i32_0 : i32, i32, i32
  }
  func.func @transform_3(%arg0: i32) -> (i32, i32, i32) {
    %c0_i32 = arith.constant 0 : i32
    %c0_i32_0 = arith.constant 0 : i32
    %c0_i32_1 = arith.constant 0 : i32
    return %arg0, %c0_i32, %c0_i32_0 : i32, i32, i32
  }
  func.func @transform_4(%arg0: i32) -> (i32, i32, i32) {
    %c0_i32 = arith.constant 0 : i32
    %c0_i32_0 = arith.constant 0 : i32
    %c0_i32_1 = arith.constant 0 : i32
    return %arg0, %c0_i32, %c0_i32_0 : i32, i32, i32
  }
}

</mosaic_0001>

<bundles_post_ra>
// kernel: tpu_custom_call.1
= control target key start
LH: loop header
LB: loop body
LE: loop exit
PB: predicated region body
PF: predicated region fallthrough
CT: control target
= control target key end

     0   :  { %10 = vsyncpa [#allocation3], 0  ;;  %s722_s0 = inlined_call_operand.hbm [shape: f32[2,4,16], index: 0, kind: input, shape index: {}]   ;;  %s723_s1 = inlined_call_operand.hbm [shape: f32[2,4,16], index: 1, kind: input, shape index: {}]   ;;  %s724_s2 = inlined_call_operand.hbm [shape: f32[1,1,128], index: 2, kind: output, shape index: {0}]   ;;  %s725_s3 = inlined_call_operand.hbm [shape: f32[1,1,128], index: 3, kind: output, shape index: {1}]   ;;  %s726_s4 = inlined_call_operand.hbm [shape: f32[1,1,128], index: 4, kind: output, shape index: {2}]  }
   0x1   :  { %11 = vsyncpa [#allocation6], 0 }
   0x2   :  { %12 = vsyncpa [#allocation4], 0 }
   0x3   :  { %13 = vsyncpa [#allocation9], 0  ;;  %s602_s15 = smov [#allocation2]   ;;  %s484_s19 = scalar_lea.hbm %s722_s0, 128 }
   0x4   :  { %s19_s16 = sshll.u32 %s602_s15, 4  ;;  %p485_p0 = scmp.ne.s32.totalorder %s722_s0, %s484_s19  ;;  %s20_s16 = int_to_ptr.vmem [resolvable:$true] %s19_s16 }
   0x5   :  { %p488_p1 = scmp.lt.u32.totalorder %s484_s19, %s722_s0 }
   0x7   :  { %p490_p2 = pnand %p488_p1, %p485_p0 }
   0x9   :  { %493 = shalt.err (!%p490_p2)
}
   0xa   :  { %s494_s24 = scalar_lea.vmem %s20_s16, 128  ;;  %p499_p4 = scmp.lt.s32.totalorder %s20_s16, %s20_s16 }
   0xb   :  { %p495_p3 = scmp.ne.s32.totalorder %s20_s16, %s494_s24  ;;  %p500_p5 = scmp.lt.s32.totalorder %s494_s24, %s494_s24 }
   0xd   :  { %p501_p6 = por %p500_p5, %p499_p4 }
   0xf   :  { %p502_p7 = pnand %p501_p6, %p495_p3 }
  0x11   :  { %505 = shalt.err (!%p502_p7)
}
  0x12   :  { %s603_s25 = smov 64   ;;  %s604_s26 = smov 4  }
  0x13   :  { %25 = dma.hbm_to_vmem [thread:$0]  %s722_s0, 128, %s20_s16, [#allocation3], %s603_s25, %s603_s25, %s604_s26  }
  0x14   :  { %s605_s29 = smov [#allocation5]   ;;  %s506_s7 = scalar_lea.hbm %s723_s1, 128 }
  0x15   :  { %s31_s30 = sshll.u32 %s605_s29, 4  ;;  %p507_p8 = scmp.ne.s32.totalorder %s723_s1, %s506_s7  ;;  %s32_s30 = int_to_ptr.vmem [resolvable:$true] %s31_s30 }
  0x16   :  { %p510_p9 = scmp.lt.u32.totalorder %s506_s7, %s723_s1 }
  0x18   :  { %p512_p10 = pnand %p510_p9, %p507_p8 }
  0x1a   :  { %515 = shalt.err (!%p512_p10)
}
  0x1b   :  { %s516_s12 = scalar_lea.vmem %s32_s30, 128  ;;  %p521_p12 = scmp.lt.s32.totalorder %s32_s30, %s32_s30 }
  0x1c   :  { %p517_p11 = scmp.ne.s32.totalorder %s32_s30, %s516_s12  ;;  %p522_p13 = scmp.lt.s32.totalorder %s516_s12, %s516_s12 }
  0x1e   :  { %p523_p0 = por %p522_p13, %p521_p12 }
  0x20   :  { %p524_p1 = pnand %p523_p0, %p517_p11 }
  0x22   :  { %527 = shalt.err (!%p524_p1)
}
  0x23   :  { %37 = dma.hbm_to_vmem [thread:$0]  %s723_s1, 128, %s32_s30, [#allocation6], %s603_s25, %s603_s25, %s604_s26  }
  0x24   :  { %594 = dma.done.wait [#allocation3], 128  }
  0x25   :  { %595 = vsyncadd [#allocation3], 4294967168 }
  0x26   :  { %596 = dma.done.wait [#allocation6], 128  }
  0x27   :  { %597 = vsyncadd [#allocation6], 4294967168  ;;  %v606_v0 = vmov 0.0   ;;  %vm607_vm0 = vmmov 0   ;;  %vm48_vm1 = vcmask 130048   ;;  %vm343_vm2 = vcmask 27648  }
  0x28   :  { %449 = vmatprep.subr.mxu0 %v606_v0  ;;  %454 = vmatprep.subr.mxu1 %v606_v0  ;;  %v44_v1 = vld [vmem:[#allocation2] sm:$0xf]  ;;  %v45_v2 = vld [vmem:[#allocation2 + $0x4] sm:$0xf]  ;;  %v46_v3 = vld [vmem:[#allocation5] sm:$0xf] }
  0x29   :  { %451 = vmatprep.mubr.msk.f32.mxu0 %vm607_vm0, %v606_v0  ;;  %456 = vmatprep.mubr.msk.f32.mxu1 %vm607_vm0, %v606_v0  ;;  %v47_v4 = vld [vmem:[#allocation5 + $0x4] sm:$0xf]  ;;  %s608_s1 = smov [#allocation7]   ;;  %s609_s16 = smov [#allocation8]  }
  0x2a   :  { %450 = vmatpush3.xpose.msk.msra.mxu0 %vm48_vm1, %v44_v1  ;;  %455 = vmatpush3.xpose.msk.msra.mxu1 %vm48_vm1, %v45_v2  ;;  %s396_s14 = sshll.u32 %s608_s1, 4  ;;  %s406_s17 = sshll.u32 %s609_s16, 4  ;;  %s397_s14 = int_to_ptr.vmem [resolvable:$true] %s396_s14  ;;  %s407_s17 = int_to_ptr.vmem [resolvable:$true] %s406_s17 }
  0x2b   :  { %459 = vmatprep.subr.mxu0 %v606_v0  ;;  %464 = vmatprep.subr.mxu1 %v606_v0  ;;  %s610_s18 = smov [#allocation10]   ;;  %s528_s20 = scalar_lea.vmem %s397_s14, 16 }
  0x2c   :  { %s416_s19 = sshll.u32 %s610_s18, 4  ;;  %p529_p2 = scmp.ne.s32.totalorder %s397_s14, %s528_s20  ;;  %s690_s19 = int_to_ptr.vmem [resolvable:$true] %s416_s19 }
  0x2d   :  { %452 = vmatmul.mubr.msk.f32.vlgmr.msra.gmra.mrb[0].mxu0 %vm48_vm1, %v44_v1  ;;  %457 = vmatmul.mubr.msk.f32.vlgmr.msra.gmra.mrb[0].mxu1 %vm48_vm1, %v45_v2  ;;  %s532_s21 = scalar_lea.vmem %s397_s14, 32  ;;  %p533_p3 = scmp.lt.s32.totalorder %s397_s14, %s397_s14 }
  0x2e   :  { %460 = vmatpush3.xpose.msk.msra.mxu0 %vm48_vm1, %v46_v3  ;;  %465 = vmatpush3.xpose.msk.msra.mxu1 %vm48_vm1, %v47_v4  ;;  %p534_p4 = scmp.lt.s32.totalorder %s532_s21, %s528_s20 }
  0x2f   :  { %461 = vmatprep.mubr.msk.f32.mxu0 %vm607_vm0, %v606_v0  ;;  %466 = vmatprep.mubr.msk.f32.mxu1 %vm607_vm0, %v606_v0 }
  0x30   :  { %p535_p5 = por %p534_p4, %p533_p3 }
  0x31   :  { %462 = vmatmul.mubr.msk.f32.vlgmr.msra.gmra.mrb[2].mxu0 %vm48_vm1, %v46_v3  ;;  %467 = vmatmul.mubr.msk.f32.vlgmr.msra.gmra.mrb[2].mxu1 %vm48_vm1, %v47_v4 }
  0x32   :  { %p536_p6 = pnand %p535_p5, %p529_p2 }
 0x100   :  { %v118_v5 = vpop.f32.mrb[0].mxu0  ;;  %v191_v6 = vpop.f32.mrb[0].mxu1 }
 0x101   :  { %v341_v7 = vmul.f32 %v118_v5, %v118_v5  ;;  %v342_v8 = vmul.f32 %v191_v6, %v191_v6  ;;  %v453_v9 = vpop.f32.mrb[1].mxu0  ;;  %v458_v10 = vpop.f32.mrb[1].mxu1 }
 0x103   :  { %v344_v11 = vsel %vm343_vm2, %v341_v7, 0.0  ;;  %v345_v12 = vsel %vm343_vm2, %v342_v8, 0.0 }
 0x104   :  { %v264_v13 = vpop.f32.mrb[2].mxu0  ;;  %v337_v14 = vpop.f32.mrb[2].mxu1  ;;  %v346_v15 = vadd.f32 %v345_v12, %v344_v11 }
 0x105   :  { %v356_v16 = vmul.f32 %v264_v13, %v264_v13  ;;  %v370_v17 = vmul.f32 %v264_v13, %v118_v5  ;;  %v357_v18 = vmul.f32 %v337_v14, %v337_v14  ;;  %v371_v19 = vmul.f32 %v337_v14, %v191_v6  ;;  %v463_v20 = vpop.f32.mrb[3].mxu0  ;;  %v468_v21 = vpop.f32.mrb[3].mxu1 }
 0x106   :  { %347 = vadd.xlane.f32.xlu0 %v346_v15 }
 0x107   :  { %v372_v22 = vsel %vm343_vm2, %v370_v17, 0.0  ;;  %v373_v23 = vsel %vm343_vm2, %v371_v19, 0.0  ;;  %v358_v24 = vsel %vm343_vm2, %v356_v16, 0.0  ;;  %v359_v25 = vsel %vm343_vm2, %v357_v18, 0.0 }
 0x108   :  { %v374_v26 = vadd.f32 %v373_v23, %v372_v22  ;;  %v360_v27 = vadd.f32 %v359_v25, %v358_v24 }
 0x10a   :  { %375 = vadd.xlane.f32.xlu1 %v374_v26  ;;  %361 = vadd.xlane.f32.xlu0 %v360_v27 }
 0x193   :  { %v348_v28 = vpop.xlane.xlu0 %347 }
 0x194   :  { %v349_v29 = vrot.slane %v348_v28, 4 }
 0x196   :  { %v350_v30 = vadd.f32 %v349_v29, %v348_v28 }
 0x197   :  { %v376_v31 = vpop.xlane.xlu1 %375  ;;  %v362_v32 = vpop.xlane.xlu0 %361 }
 0x198   :  { %v351_v33 = vrot.slane %v350_v30, 2  ;;  %v377_v34 = vrot.slane %v376_v31, 4  ;;  %v363_v35 = vrot.slane %v362_v32, 4 }
 0x19a   :  { %v378_v36 = vadd.f32 %v377_v34, %v376_v31  ;;  %v364_v37 = vadd.f32 %v363_v35, %v362_v32  ;;  %v352_v38 = vadd.f32 %v351_v33, %v350_v30 }
 0x19c   :  { %v379_v39 = vrot.slane %v378_v36, 2  ;;  %v365_v40 = vrot.slane %v364_v37, 2  ;;  %v353_v41 = vrot.slane %v352_v38, 1 }
 0x19e   :  { %v380_v42 = vadd.f32 %v379_v39, %v378_v36  ;;  %v366_v43 = vadd.f32 %v365_v40, %v364_v37  ;;  %v354_v44 = vadd.f32 %v353_v41, %v352_v38 }
 0x1a0   :  { %469 = vpush %v354_v44  ;;  %v367_v45 = vrot.slane %v366_v43, 1  ;;  %v381_v46 = vrot.slane %v380_v42, 1 }
 0x1a2   :  { %v368_v47 = vadd.f32 %v367_v45, %v366_v43  ;;  %v382_v48 = vadd.f32 %v381_v46, %v380_v42 }
 0x1a4   :  { %471 = vpush %v368_v47 }
 0x1a5   :  { %473 = vpush %v382_v48 }
 0x1d1   :  { %s470_s15 = spop %469 }
 0x1d2   :  { %v384_v49 = vstv %s470_s15 }
 0x1d3   :  { %385 = vst [vmem:[#allocation7] sm:$0x1] %v384_v49 }
 0x1d4   :  { %539 = shalt.err (!%p536_p6)
}
 0x1d5   :  { %s540_s24 = scalar_lea.hbm %s724_s2, 16 }
 0x1d6   :  { %p541_p7 = scmp.ne.s32.totalorder %s724_s2, %s540_s24  ;;  %p544_p8 = scmp.lt.u32.totalorder %s540_s24, %s724_s2 }
 0x1d8   :  { %p546_p9 = pnand %p544_p8, %p541_p7 }
 0x1da   :  { %549 = shalt.err (!%p546_p9)
}
 0x1db   :  { %399 = dma.vmem_to_hbm [thread:$0]  %s397_s14, 16, %s724_s2, [#allocation4]  }
 0x1dc   :  { %s472_s5 = spop %471  ;;  %s550_s7 = scalar_lea.vmem %s407_s17, 16 }
 0x1dd   :  { %v386_v50 = vstv %s472_s5  ;;  %s474_s6 = spop %473  ;;  %p551_p10 = scmp.ne.s32.totalorder %s407_s17, %s550_s7 }
 0x1de   :  { %387 = vst [vmem:[#allocation8] sm:$0x1] %v386_v50  ;;  %v388_v51 = vstv %s474_s6  ;;  %s554_s8 = scalar_lea.vmem %s407_s17, 32  ;;  %p555_p11 = scmp.lt.s32.totalorder %s407_s17, %s407_s17 }
 0x1df   :  { %389 = vst [vmem:[#allocation10] sm:$0x1] %v388_v51  ;;  %p556_p12 = scmp.lt.s32.totalorder %s554_s8, %s550_s7 }
 0x1e1   :  { %p557_p13 = por %p556_p12, %p555_p11 }
 0x1e3   :  { %p558_p0 = pnand %p557_p13, %p551_p10 }
 0x1e5   :  { %561 = shalt.err (!%p558_p0)
}
 0x1e6   :  { %s562_s2 = scalar_lea.hbm %s725_s3, 16 }
 0x1e7   :  { %p563_p1 = scmp.ne.s32.totalorder %s725_s3, %s562_s2  ;;  %p566_p2 = scmp.lt.u32.totalorder %s562_s2, %s725_s3 }
 0x1e9   :  { %p568_p3 = pnand %p566_p2, %p563_p1 }
 0x1eb   :  { %571 = shalt.err (!%p568_p3)
}
 0x1ec   :  { %409 = dma.vmem_to_hbm [thread:$0]  %s407_s17, 16, %s725_s3, [#allocation9]  }
 0x1ed   :  { %s572_s15 = scalar_lea.vmem %s690_s19, 16  ;;  %s576_s16 = scalar_lea.vmem %s690_s19, 32 }
 0x1ee   :  { %p573_p4 = scmp.ne.s32.totalorder %s690_s19, %s572_s15  ;;  %p577_p5 = scmp.lt.s32.totalorder %s690_s19, %s690_s19 }
 0x1ef   :  { %p578_p6 = scmp.lt.s32.totalorder %s576_s16, %s572_s15 }
 0x1f1   :  { %p579_p7 = por %p578_p6, %p577_p5 }
 0x1f3   :  { %p580_p8 = pnand %p579_p7, %p573_p4 }
 0x1f5   :  { %583 = shalt.err (!%p580_p8)
}
 0x1f6   :  { %s584_s21 = scalar_lea.hbm %s726_s4, 16 }
 0x1f7   :  { %p585_p9 = scmp.ne.s32.totalorder %s726_s4, %s584_s21  ;;  %p588_p10 = scmp.lt.u32.totalorder %s584_s21, %s726_s4 }
 0x1f9   :  { %p590_p11 = pnand %p588_p10, %p585_p9 }
 0x1fb   :  { %593 = shalt.err (!%p590_p11)
}
 0x1fc   :  { %419 = dma.vmem_to_hbm [thread:$0]  %s690_s19, 16, %s726_s4, [#allocation9]  }
 0x1fd   :  { %598 = dma.done.wait [#allocation4], 16  }
 0x1fe   :  { %599 = vsyncadd [#allocation4], 4294967280 }
 0x1ff   :  { %600 = dma.done.wait [#allocation9], 32  }
 0x200   :  { %601 = vsyncadd [#allocation9], 4294967264 }
 0x201   :  { %429 = vsyncpa [#allocation3], 1 }
 0x202   :  { %430 = vsyncpa [#allocation6], 1 }
 0x203   :  { %431 = vsyncpa [#allocation4], 1 }
 0x204   :  { %432 = vsyncpa [#allocation9], 1 }

</bundles_post_ra>
